<compile_context>
chip_gen: v7x
topology: tpu7x:2x2x1
jax: 0.10.0
libtpu: 0.0.40
codegen_flags: <defaults>
</compile_context>

<pallas_src>
import jax
import jax.numpy as jnp
from jax.experimental import pallas as pl
from jax.experimental.pallas import tpu as pltpu


_LANE_CHOICES = (1024, 512, 256, 128)     # lane-dense last dims (multiples of 128)
_BYPASS_BYTES = 8 * 1024 * 1024           # plain XLA add below ~8 MiB

# Conservative config (safe on v7x: 64 MiB VMEM per TC, scoped default 32 MiB).
_BLOCK_BYTES_SMALL_VMEM = 4 * 1024 * 1024   # per operand per grid step
_VMEM_LIMIT_SMALL_VMEM = 40 * 1024 * 1024
# Larger config for 128 MiB-VMEM chips (v5e / v6e).
_BLOCK_BYTES_BIG_VMEM = 8 * 1024 * 1024
_VMEM_LIMIT_BIG_VMEM = 56 * 1024 * 1024


def _chip_config():
    """Pick (block_bytes_per_operand, vmem_limit_bytes) for the local chip."""
    try:
        vmem = int(getattr(pltpu.get_tpu_info(), "vmem_capacity_bytes"))
    except Exception:
        vmem = 0
    if vmem >= 100 * 1024 * 1024:           # v5e / v6e: 128 MiB VMEM
        return _BLOCK_BYTES_BIG_VMEM, _VMEM_LIMIT_BIG_VMEM
    return _BLOCK_BYTES_SMALL_VMEM, _VMEM_LIMIT_SMALL_VMEM   # v7x / unknown


def _daf_add_kernel(x_ref, r_ref, o_ref):
    # Pure element-wise add on the whole VMEM tile (VPU); kernel is HBM-bound.
    o_ref[...] = x_ref[...] + r_ref[...]


def daf_forward(x, residual, *, force_pallas=False):
    """DirectAddFuse: x + residual, implemented as a Pallas TPU kernel."""
    assert x.shape == residual.shape, "DAF requires matching shapes"
    assert x.dtype == residual.dtype

    orig_shape = x.shape
    n = x.size
    itemsize = jnp.dtype(x.dtype).itemsize

    # Tiny-input bypass: a standalone XLA add is already at the HBM roofline
    # and avoids pallas_call launch / DMA-setup overhead.
    if n == 0 or (not force_pallas and n * itemsize < _BYPASS_BYTES):
        return x + residual

    # Largest lane width (multiple of 128) that divides n -> no pad, no slice.
    lane = next((l for l in _LANE_CHOICES if n % l == 0), None)
    if lane is None:
        # n not a multiple of 128: XLA add (roofline) beats pad+kernel+slice.
        return x + residual

    rows = n // lane
    x2 = x.reshape(rows, lane)              # metadata-only reshape (contiguous)
    r2 = residual.reshape(rows, lane)

    block_bytes, vmem_limit = _chip_config()
    sub = 8 * max(1, 4 // itemsize)         # sublane packing: 8/16/32 rows
    target_rows = max(sub, (block_bytes // (lane * itemsize)) // sub * sub)

    total_bytes = n * itemsize
    if rows <= target_rows:
        if total_bytes >= (2 << 20) and rows >= 2 * sub:
            # Mid-size tensor: force >= 2 grid steps so "parallel" can shard
            # the blocks across both TensorCores on v7x.
            half = -(-rows // 2)
            tile_rows = -(-half // sub) * sub      # multiple of sublane packing
        else:
            tile_rows = rows                        # single block = full dims
    else:
        tile_rows = target_rows                     # multiple of sublane packing

    grid = (pl.cdiv(rows, tile_rows),)              # partial last block is masked

    out2 = pl.pallas_call(
        _daf_add_kernel,
        out_shape=jax.ShapeDtypeStruct((rows, lane), x.dtype),
        grid_spec=pltpu.PrefetchScalarGridSpec(
            num_scalar_prefetch=0,
            grid=grid,
            in_specs=[
                pl.BlockSpec((tile_rows, lane), lambda i: (i, 0)),
                pl.BlockSpec((tile_rows, lane), lambda i: (i, 0)),
            ],
            out_specs=pl.BlockSpec((tile_rows, lane), lambda i: (i, 0)),
        ),
        compiler_params=pltpu.CompilerParams(
            dimension_semantics=("parallel",),
            vmem_limit_bytes=vmem_limit,
        ),
    )(x2, r2)

    return out2.reshape(orig_shape)


if __name__ == "__main__":
    key = jax.random.PRNGKey(0)
    kx, kr, kx2, kr2, kx3, kr3 = jax.random.split(key, 6)

    # 1) NCHW feature-map fusion shape; force the Pallas path (n = 2048 = 2*1024).
    B, C, H, W = 2, 4, 16, 16
    x = jax.random.normal(kx, (B, C, H, W), dtype=jnp.float32)
    residual = jax.random.normal(kr, (B, C, H, W), dtype=jnp.float32)
    ref = x + residual
    out = jax.block_until_ready(daf_forward(x, residual, force_pallas=True))
    assert out.shape == (B, C, H, W)
    assert jnp.allclose(out, ref, atol=1e-6, rtol=1e-6)

    # 2) Default path (tiny input -> XLA bypass) must also match.
    out_bypass = jax.block_until_ready(daf_forward(x, residual))
    assert jnp.allclose(out_bypass, ref, atol=1e-6, rtol=1e-6)

    # 3) A non-1024-divisible shape (12800 = 25*512): exercises smaller lane pick.
    x3 = jax.random.normal(kx2, (2, 4, 40, 40), dtype=jnp.float32)
    r3 = jax.random.normal(kr2, (2, 4, 40, 40), dtype=jnp.float32)
    out3 = jax.block_until_ready(daf_forward(x3, r3, force_pallas=True))
    assert jnp.allclose(out3, x3 + r3, atol=1e-6, rtol=1e-6)

    # 4) A 2 MiB tensor: exercises the >=2-grid-step (dual-TC) split path.
    x4 = jax.random.normal(kx3, (8, 16, 64, 64), dtype=jnp.float32)
    r4 = jax.random.normal(kr3, (8, 16, 64, 64), dtype=jnp.float32)
    out4 = jax.block_until_ready(daf_forward(x4, r4, force_pallas=True))
    assert jnp.allclose(out4, x4 + r4, atol=1e-6, rtol=1e-6)

    print("KERNEL_OK")
</pallas_src>

<mosaic_0001>
module attributes {stable_mosaic.version = 11 : i64} {
  func.func @_daf_add_kernel(%arg0: i32, %arg1: memref<2x1024xf32, #tpu.memory_space<vmem>>, %arg2: memref<2x1024xf32, #tpu.memory_space<vmem>>, %arg3: memref<2x1024xf32, #tpu.memory_space<vmem>>) attributes {dimension_semantics = [#tpu.dimension_semantics<parallel>], iteration_bounds = array<i64: 1>, scalar_prefetch = 0 : i64, scratch_operands = 0 : i64, tpu.core_type = #tpu.core_type<tc>, window_params = [{transform_indices = @transform_0, window_bounds = array<i64: 2, 1024>}, {transform_indices = @transform_1, window_bounds = array<i64: 2, 1024>}, {transform_indices = @transform_2, window_bounds = array<i64: 2, 1024>}]} {
    %c0 = arith.constant 0 : index
    %c0_0 = arith.constant 0 : index
    %0 = vector.load %arg1[%c0, %c0_0] : memref<2x1024xf32, #tpu.memory_space<vmem>>, vector<2x1024xf32>
    %c0_1 = arith.constant 0 : index
    %c0_2 = arith.constant 0 : index
    %1 = vector.load %arg2[%c0_1, %c0_2] : memref<2x1024xf32, #tpu.memory_space<vmem>>, vector<2x1024xf32>
    %2 = arith.addf %0, %1 : vector<2x1024xf32>
    %c0_3 = arith.constant 0 : index
    %c0_4 = arith.constant 0 : index
    %3 = vector.load %arg3[%c0_3, %c0_4] : memref<2x1024xf32, #tpu.memory_space<vmem>>, vector<2x1024xf32>
    tpu.vector_store %arg3[%c0_3, %c0_4], %2 {strides = array<i32>} : memref<2x1024xf32, #tpu.memory_space<vmem>>, vector<2x1024xf32>,
    return
  }
  func.func @transform_0(%arg0: i32) -> (i32, i32) {
    %c0_i32 = arith.constant 0 : i32
    %c0_i32_0 = arith.constant 0 : i32
    return %arg0, %c0_i32 : i32, i32
  }
  func.func @transform_1(%arg0: i32) -> (i32, i32) {
    %c0_i32 = arith.constant 0 : i32
    %c0_i32_0 = arith.constant 0 : i32
    return %arg0, %c0_i32 : i32, i32
  }
  func.func @transform_2(%arg0: i32) -> (i32, i32) {
    %c0_i32 = arith.constant 0 : i32
    %c0_i32_0 = arith.constant 0 : i32
    return %arg0, %c0_i32 : i32, i32
  }
}

</mosaic_0001>

<bundles_post_ra>
// kernel: tpu_custom_call.1
= control target key start
LH: loop header
LB: loop body
LE: loop exit
PB: predicated region body
PF: predicated region fallthrough
CT: control target
= control target key end

     0   :  { %7 = vsyncpa [#allocation3], 0  ;;  %s189_s0 = inlined_call_operand.hbm [shape: f32[2,1024], index: 0, kind: input, shape index: {}]   ;;  %s190_s1 = inlined_call_operand.hbm [shape: f32[2,1024], index: 1, kind: input, shape index: {}]   ;;  %s191_s2 = inlined_call_operand.hbm [shape: f32[2,1024], index: 2, kind: output, shape index: {}]  }
   0x1   :  { %8 = vsyncpa [#allocation6], 0 }
   0x2   :  { %9 = vsyncpa [#allocation4], 0  ;;  %s135_s9 = smov [#allocation2]   ;;  %s136_s11 = smov [#allocation5]  }
   0x3   :  { %s16_s10 = sshll.u32 %s135_s9, 4  ;;  %s26_s12 = sshll.u32 %s136_s11, 4  ;;  %s17_s10 = int_to_ptr.vmem [resolvable:$true] %s16_s10  ;;  %s27_s12 = int_to_ptr.vmem [resolvable:$true] %s26_s12 }
   0x4   :  { %s63_s15 = scalar_lea.hbm %s189_s0, 256 }
   0x5   :  { %p64_p0 = scmp.ne.s32.totalorder %s189_s0, %s63_s15  ;;  %p67_p1 = scmp.lt.u32.totalorder %s63_s15, %s189_s0 }
   0x7   :  { %p69_p2 = pnand %p67_p1, %p64_p0 }
   0x9   :  { %72 = shalt.err (!%p69_p2)
}
   0xa   :  { %s73_s20 = scalar_lea.vmem %s17_s10, 256  ;;  %p78_p4 = scmp.lt.s32.totalorder %s17_s10, %s17_s10 }
   0xb   :  { %p74_p3 = scmp.ne.s32.totalorder %s17_s10, %s73_s20  ;;  %p79_p5 = scmp.lt.s32.totalorder %s73_s20, %s73_s20 }
   0xd   :  { %p80_p6 = por %p79_p5, %p78_p4 }
   0xf   :  { %p81_p7 = pnand %p80_p6, %p74_p3 }
  0x11   :  { %84 = shalt.err (!%p81_p7)
}
  0x12   :  { %19 = dma.hbm_to_vmem [thread:$0]  %s189_s0, 256, %s17_s10, [#allocation3]  }
  0x13   :  { %s85_s25 = scalar_lea.hbm %s190_s1, 256 }
  0x14   :  { %p86_p8 = scmp.ne.s32.totalorder %s190_s1, %s85_s25  ;;  %p89_p9 = scmp.lt.u32.totalorder %s85_s25, %s190_s1 }
  0x16   :  { %p91_p10 = pnand %p89_p9, %p86_p8 }
  0x18   :  { %94 = shalt.err (!%p91_p10)
}
  0x19   :  { %s95_s30 = scalar_lea.vmem %s27_s12, 256  ;;  %p100_p12 = scmp.lt.s32.totalorder %s27_s12, %s27_s12 }
  0x1a   :  { %p96_p11 = scmp.ne.s32.totalorder %s27_s12, %s95_s30  ;;  %p101_p13 = scmp.lt.s32.totalorder %s95_s30, %s95_s30 }
  0x1c   :  { %p102_p0 = por %p101_p13, %p100_p12 }
  0x1e   :  { %p103_p1 = pnand %p102_p0, %p96_p11 }
  0x20   :  { %106 = shalt.err (!%p103_p1)
}
  0x21   :  { %29 = dma.hbm_to_vmem [thread:$0]  %s190_s1, 256, %s27_s12, [#allocation6]  }
  0x22   :  { %129 = dma.done.wait [#allocation3], 256  }
  0x23   :  { %130 = vsyncadd [#allocation3], 4294967040 }
  0x24   :  { %131 = dma.done.wait [#allocation6], 256  }
  0x25   :  { %132 = vsyncadd [#allocation6], 4294967040  ;;  %s137_s4 = smov [#allocation7]   ;;  %v36_v0 = vld [vmem:[#allocation2] sm:$0xff]  ;;  %v38_v1 = vld [vmem:[#allocation5] sm:$0xff] }
  0x26   :  { %s50_s5 = sshll.u32 %s137_s4, 4  ;;  %v37_v2 = vld [vmem:[#allocation2 + $0x8] sm:$0xff]  ;;  %v40_v3 = vadd.f32 %v38_v1, %v36_v0  ;;  %v39_v4 = vld [vmem:[#allocation5 + $0x8] sm:$0xff]  ;;  %s51_s5 = int_to_ptr.vmem [resolvable:$true] %s50_s5 }
  0x27   :  { %v41_v5 = vadd.f32 %v39_v4, %v37_v2  ;;  %s107_s6 = scalar_lea.vmem %s51_s5, 256  ;;  %p112_p3 = scmp.lt.s32.totalorder %s51_s5, %s51_s5 }
  0x28   :  { %42 = vst [vmem:[#allocation7] sm:$0xff] %v40_v3  ;;  %p108_p2 = scmp.ne.s32.totalorder %s51_s5, %s107_s6  ;;  %p113_p4 = scmp.lt.s32.totalorder %s107_s6, %s107_s6 }
  0x29   :  { %43 = vst [vmem:[#allocation7 + $0x8] sm:$0xff] %v41_v5 }
  0x2a   :  { %p114_p5 = por %p113_p4, %p112_p3 }
  0x2c   :  { %p115_p6 = pnand %p114_p5, %p108_p2 }
  0x2e   :  { %118 = shalt.err (!%p115_p6)
}
  0x2f   :  { %s119_s8 = scalar_lea.hbm %s191_s2, 256 }
  0x30   :  { %p120_p7 = scmp.ne.s32.totalorder %s191_s2, %s119_s8  ;;  %p123_p8 = scmp.lt.u32.totalorder %s119_s8, %s191_s2 }
  0x32   :  { %p125_p9 = pnand %p123_p8, %p120_p7 }
  0x34   :  { %128 = shalt.err (!%p125_p9)
}
  0x35   :  { %53 = dma.vmem_to_hbm [thread:$0]  %s51_s5, 256, %s191_s2, [#allocation4]  }
  0x36   :  { %133 = dma.done.wait [#allocation4], 256  }
  0x37   :  { %134 = vsyncadd [#allocation4], 4294967040 }
  0x38   :  { %57 = vsyncpa [#allocation3], 1 }
  0x39   :  { %58 = vsyncpa [#allocation6], 1 }
  0x3a   :  { %59 = vsyncpa [#allocation4], 1 }

</bundles_post_ra>
